<compile_context>
chip_gen: v6e
topology: v6e:2x2x1
jax: 0.10.0
libtpu: 0.0.40
codegen_flags: <defaults>
</compile_context>

<pallas_src>
import functools
import numpy as np
import jax
import jax.numpy as jnp
from jax.experimental import pallas as pl
from jax.experimental.pallas import tpu as pltpu


def _bicubic_quarter_taps():
    # PyTorch bicubic kernel, a = -0.75. For scale 1/4 the source fraction is 0.5,
    # so the 4 taps sit at distances 1.5, 0.5, 0.5, 1.5 from the source coordinate.
    a = -0.75

    def w(d):
        d = abs(d)
        if d < 1.0:
            return (a + 2.0) * d**3 - (a + 3.0) * d**2 + 1.0
        return a * d**3 - 5.0 * a * d**2 + 8.0 * a * d - 4.0 * a

    return np.array([w(1.5), w(0.5), w(0.5), w(1.5)], dtype=np.float32)


def _downsample_matrix(in_size):
    """(out, in) matrix so that down = M @ x performs the 1/4 bicubic downsample."""
    out_size = in_size // 4
    taps = _bicubic_quarter_taps()
    M = np.zeros((out_size, in_size), dtype=np.float32)
    for i in range(out_size):
        M[i, 4 * i:4 * i + 4] = taps
    return M


def _pick_block_planes(NC, Ho, H, W, itemsize, target_bytes=2 << 20):
    """Planes per grid step: largest divisor of NC whose x_hr block is <= ~2 MiB
    (double-buffering headroom even on v7x) with a sublane count that is a
    multiple of 8 (unless the block spans the whole array)."""
    valid = [b for b in range(1, NC + 1)
             if NC % b == 0 and (b == NC or (b * Ho) % 8 == 0)]
    under = [b for b in valid if b * H * W * itemsize <= target_bytes]
    return max(under) if under else min(valid)


def _cycle_loss_kernel(w_ref, xhr_ref, xlr_ref, out_ref, acc_ref, *, use_l1):
    i = pl.program_id(1)

    @pl.when(i == 0)
    def _():
        acc_ref[...] = jnp.zeros_like(acc_ref)

    x = xhr_ref[...]                       # (TR, 4W), native dtype
    if x.dtype != w_ref.dtype:
        x = x.astype(w_ref.dtype)
    # Combined separable bicubic downsample: one MXU call, f32 accumulation.
    down = jnp.dot(x, w_ref[...], preferred_element_type=jnp.float32)   # (TR, Wo)
    diff = down - xlr_ref[...].astype(jnp.float32)
    # Elementwise (VPU-only) accumulation each step; reduce once at the end.
    acc_ref[...] += jnp.abs(diff) if use_l1 else diff * diff

    @pl.when(i == pl.num_programs(1) - 1)
    def _():
        out_ref[...] = jnp.sum(acc_ref[...]).reshape(1, 1, 1)


def cycle_loss(x_hr, x_lr, loss_type="L1"):
    """Pallas implementation of CycleLoss.forward(x_hr, x_lr, scale=1/4)."""
    if loss_type not in ("L1", "MSE"):
        raise ValueError("loss_type must be 'L1' or 'MSE'")

    N, C, H, W = x_hr.shape
    assert H % 4 == 0 and W % 4 == 0, "H and W must be divisible by 4"
    Ho, Wo = H // 4, W // 4
    NC = N * C
    assert x_lr.shape == (N, C, Ho, Wo)

    # Free row-major reshapes (no data movement): group each 4 consecutive HR rows.
    xhr2 = x_hr.reshape(NC * Ho, 4 * W)
    xlr2 = x_lr.reshape(NC * Ho, Wo)

    # Combined separable weight: Wfull[k*W + w, v] = tap_h[k] * Ww[v, w].
    taps = _bicubic_quarter_taps()                      # (4,)
    ww = _downsample_matrix(W)                          # (Wo, W)
    wfull_np = (taps[:, None, None] * ww.T[None, :, :]).reshape(4 * W, Wo)
    # Feed the MXU operands in the input dtype (bf16 stays bf16; f32 acc always).
    w_dtype = x_hr.dtype if x_hr.dtype in (jnp.float32, jnp.bfloat16) else jnp.float32
    wfull = jnp.asarray(wfull_np, dtype=w_dtype)

    B = _pick_block_planes(NC, Ho, H, W, x_hr.dtype.itemsize)
    TR = B * Ho                      # rows of the reshaped arrays per grid step
    nblk = NC // B
    # Split blocks across the two v7x TensorCores when evenly possible.
    G = 2 if nblk % 2 == 0 else 1
    inner = nblk // G

    kernel = functools.partial(_cycle_loss_kernel, use_l1=(loss_type == "L1"))
    partials = pl.pallas_call(
        kernel,
        out_shape=jax.ShapeDtypeStruct((G, 1, 1), jnp.float32),
        grid_spec=pltpu.PrefetchScalarGridSpec(
            num_scalar_prefetch=0,
            grid=(G, inner),
            in_specs=[
                pl.BlockSpec((4 * W, Wo), lambda c, i: (0, 0)),              # weight (resident)
                pl.BlockSpec((TR, 4 * W), lambda c, i: (c * inner + i, 0)),  # x_hr rows
                pl.BlockSpec((TR, Wo), lambda c, i: (c * inner + i, 0)),     # x_lr rows
            ],
            out_specs=pl.BlockSpec((1, 1, 1), lambda c, i: (c, 0, 0)),       # per-core partial
            scratch_shapes=[pltpu.VMEM((TR, Wo), jnp.float32)],              # f32 accumulator
        ),
        compiler_params=pltpu.CompilerParams(
            dimension_semantics=("parallel", "arbitrary")),
    )(wfull, xhr2, xlr2)
    return jnp.sum(partials)


def _reference_loss(x_hr, x_lr):
    # Pure-JAX reference using the analytic downsample matrices.
    N, C, H, W = x_hr.shape
    wh = jnp.asarray(_downsample_matrix(H))
    ww = jnp.asarray(_downsample_matrix(W))
    down = jnp.einsum("oh,nchw,pw->ncop", wh, x_hr.astype(jnp.float32), ww)
    return jnp.sum(jnp.abs(down - x_lr.astype(jnp.float32)))


if __name__ == "__main__":
    key = jax.random.PRNGKey(0)
    k1, k2 = jax.random.split(key)
    N, C, H, W = 2, 4, 16, 16
    x_hr = jax.random.normal(k1, (N, C, H, W), dtype=jnp.float32)
    x_lr = jax.random.normal(k2, (N, C, H // 4, W // 4), dtype=jnp.float32)

    loss = cycle_loss(x_hr, x_lr, loss_type="L1")
    jax.block_until_ready(loss)

    ref = _reference_loss(x_hr, x_lr)
    np.testing.assert_allclose(np.asarray(loss), np.asarray(ref),
                               rtol=1e-4, atol=1e-3)
    print("KERNEL_OK")
</pallas_src>

<mosaic_0001>
module attributes {stable_mosaic.version = 11 : i64} {
  func.func @_cycle_loss_kernel(%arg0: i32, %arg1: i32, %arg2: memref<64x4xf32, #tpu.memory_space<vmem>>, %arg3: memref<32x64xf32, #tpu.memory_space<vmem>>, %arg4: memref<32x4xf32, #tpu.memory_space<vmem>>, %arg5: memref<1x1x1xf32, #tpu.memory_space<vmem>>, %arg6: memref<32x4xf32, #tpu.memory_space<vmem>>) attributes {dimension_semantics = [#tpu.dimension_semantics<parallel>, #tpu.dimension_semantics<arbitrary>], iteration_bounds = array<i64: 1, 1>, scalar_prefetch = 0 : i64, scratch_operands = 1 : i64, tpu.core_type = #tpu.core_type<tc>, window_params = [{pipeline_mode = #tpu.pipeline_mode<synchronous>, transform_indices = @transform_0, window_bounds = array<i64: 64, 4>}, {transform_indices = @transform_1, window_bounds = array<i64: 32, 64>}, {transform_indices = @transform_2, window_bounds = array<i64: 32, 4>}, {transform_indices = @transform_3, window_bounds = array<i64: 1, 1, 1>}]} {
    %c0_i32 = arith.constant 0 : i32
    %0 = arith.cmpi eq, %arg1, %c0_i32 : i32
    %1 = arith.extui %0 : i1 to i32
    %c0_i32_0 = arith.constant 0 : i32
    %2 = arith.cmpi ne, %1, %c0_i32_0 : i32
    scf.if %2 {
      %cst_12 = arith.constant 0.000000e+00 : f32
      %15 = vector.broadcast %cst_12 : f32 to vector<32x4xf32>
      %c0_13 = arith.constant 0 : index
      %c0_14 = arith.constant 0 : index
      %16 = vector.load %arg6[%c0_13, %c0_14] : memref<32x4xf32, #tpu.memory_space<vmem>>, vector<32x4xf32>
      tpu.vector_store %arg6[%c0_13, %c0_14], %15 {strides = array<i32>} : memref<32x4xf32, #tpu.memory_space<vmem>>, vector<32x4xf32>,
    } else {
    }
    %c0 = arith.constant 0 : index
    %c0_1 = arith.constant 0 : index
    %3 = vector.load %arg3[%c0, %c0_1] : memref<32x64xf32, #tpu.memory_space<vmem>>, vector<32x64xf32>
    %c0_2 = arith.constant 0 : index
    %c0_3 = arith.constant 0 : index
    %4 = vector.load %arg2[%c0_2, %c0_3] : memref<64x4xf32, #tpu.memory_space<vmem>>, vector<64x4xf32>
    %cst = arith.constant dense<0.000000e+00> : vector<32x4xf32>
    %5 = tpu.matmul %3, %4, %cst {dimension_numbers = #tpu.dot_dimension_numbers<[1], [0], [0], [1], [0, 0, 1, 1], [], []>} : vector<32x64xf32>, vector<64x4xf32>, vector<32x4xf32> -> vector<32x4xf32>
    %c0_4 = arith.constant 0 : index
    %c0_5 = arith.constant 0 : index
    %6 = vector.load %arg4[%c0_4, %c0_5] : memref<32x4xf32, #tpu.memory_space<vmem>>, vector<32x4xf32>
    %7 = arith.subf %5, %6 : vector<32x4xf32>
    %c0_6 = arith.constant 0 : index
    %c0_7 = arith.constant 0 : index
    %8 = vector.load %arg6[%c0_6, %c0_7] : memref<32x4xf32, #tpu.memory_space<vmem>>, vector<32x4xf32>
    %9 = math.absf %7 : vector<32x4xf32>
    %10 = arith.addf %8, %9 : vector<32x4xf32>
    %c0_8 = arith.constant 0 : index
    %c0_9 = arith.constant 0 : index
    %11 = vector.load %arg6[%c0_8, %c0_9] : memref<32x4xf32, #tpu.memory_space<vmem>>, vector<32x4xf32>
    tpu.vector_store %arg6[%c0_8, %c0_9], %10 {strides = array<i32>} : memref<32x4xf32, #tpu.memory_space<vmem>>, vector<32x4xf32>,
    %c0_i32_10 = arith.constant 0 : i32
    %12 = arith.cmpi eq, %arg1, %c0_i32_10 : i32
    %13 = arith.extui %12 : i1 to i32
    %c0_i32_11 = arith.constant 0 : i32
    %14 = arith.cmpi ne, %13, %c0_i32_11 : i32
    scf.if %14 {
      %c0_12 = arith.constant 0 : index
      %c0_13 = arith.constant 0 : index
      %15 = vector.load %arg6[%c0_12, %c0_13] : memref<32x4xf32, #tpu.memory_space<vmem>>, vector<32x4xf32>
      %16 = vector.shape_cast %15 : vector<32x4xf32> to vector<1x32x4xf32>
      %cst_14 = arith.constant dense<0.000000e+00> : vector<1xf32>
      %17 = vector.multi_reduction <add>, %16, %cst_14 [1, 2] : vector<1x32x4xf32> to vector<1xf32>
      %18 = vector.shape_cast %17 : vector<1xf32> to vector<1x1x1xf32>
      %19 = vector.extract %18[0, 0, 0] : f32 from vector<1x1x1xf32>
      %20 = vector.broadcast %19 : f32 to vector<1x1x1xf32>
      %c0_15 = arith.constant 0 : index
      %c0_16 = arith.constant 0 : index
      %c0_17 = arith.constant 0 : index
      %21 = vector.load %arg5[%c0_15, %c0_16, %c0_17] : memref<1x1x1xf32, #tpu.memory_space<vmem>>, vector<1x1x1xf32>
      tpu.vector_store %arg5[%c0_15, %c0_16, %c0_17], %20 {strides = array<i32>} : memref<1x1x1xf32, #tpu.memory_space<vmem>>, vector<1x1x1xf32>,
    } else {
    }
    return
  }
  func.func @transform_0(%arg0: i32, %arg1: i32) -> (i32, i32) {
    %c0_i32 = arith.constant 0 : i32
    %c0_i32_0 = arith.constant 0 : i32
    %c0_i32_1 = arith.constant 0 : i32
    return %c0_i32, %c0_i32_0 : i32, i32
  }
  func.func @transform_1(%arg0: i32, %arg1: i32) -> (i32, i32) {
    %c1_i32 = arith.constant 1 : i32
    %0 = arith.muli %arg0, %c1_i32 : i32
    %1 = arith.addi %0, %arg1 : i32
    %c0_i32 = arith.constant 0 : i32
    %c0_i32_0 = arith.constant 0 : i32
    return %1, %c0_i32 : i32, i32
  }
  func.func @transform_2(%arg0: i32, %arg1: i32) -> (i32, i32) {
    %c1_i32 = arith.constant 1 : i32
    %0 = arith.muli %arg0, %c1_i32 : i32
    %1 = arith.addi %0, %arg1 : i32
    %c0_i32 = arith.constant 0 : i32
    %c0_i32_0 = arith.constant 0 : i32
    return %1, %c0_i32 : i32, i32
  }
  func.func @transform_3(%arg0: i32, %arg1: i32) -> (i32, i32, i32) {
    %c0_i32 = arith.constant 0 : i32
    %c0_i32_0 = arith.constant 0 : i32
    %c0_i32_1 = arith.constant 0 : i32
    return %arg0, %c0_i32, %c0_i32_0 : i32, i32, i32
  }
}

</mosaic_0001>

<bundles_post_ra>
// kernel: tpu_custom_call.1
= control target key start
LH: loop header
LB: loop body
LE: loop exit
PB: predicated region body
PF: predicated region fallthrough
CT: control target
= control target key end

     0   :  { %vm63_vm0 = vcmask 31744   ;;  %v335_v2 = vmov 0.0   ;;  %s420_s0 = inlined_call_operand.vmem [shape: f32[64,4], index: 0, kind: input, shape index: {}]   ;;  %s421_s1 = inlined_call_operand.vmem [shape: f32[32,64], index: 1, kind: input, shape index: {}]   ;;  %s422_s2 = inlined_call_operand.vmem [shape: f32[32,4], index: 2, kind: input, shape index: {}]   ;;  %s423_s3 = inlined_call_operand.hbm [shape: f32[1,1,1], index: 3, kind: output, shape index: {}]  }
   0x1   :  { %v79_v0 = vld [vmem:[%s420_s0 + $0x38] sm:$0xff]  ;;  %v78_v1 = vld [vmem:[%s420_s0 + $0x30] sm:$0xff]  ;;  %65 = vst.msk [vmem:[#allocation2 + $0x8] sm:$0xff] %vm63_vm0, %v335_v2  ;;  %64 = vst.msk [vmem:[#allocation2] sm:$0xff] %vm63_vm0, %v335_v2 }
   0x2   :  { %271 = vmatprep.subr.mxu0 %v79_v0  ;;  %293 = vmatprep.subr.mxu1 %v79_v0  ;;  %66 = vst.msk [vmem:[#allocation2 + $0x10] sm:$0xff] %vm63_vm0, %v335_v2  ;;  %67 = vst.msk [vmem:[#allocation2 + $0x18] sm:$0xff] %vm63_vm0, %v335_v2  ;;  %v77_v3 = vld [vmem:[%s420_s0 + $0x28] sm:$0xff]  ;;  %v76_v4 = vld [vmem:[%s420_s0 + $0x20] sm:$0xff] }
   0x3   :  { %272 = vmatpush3.msra.mxu0 %v79_v0  ;;  %301 = vmatpush3.msra.mxu1 %v79_v0 }
   0x4   :  { %273 = vmatprep.subr.mxu0 %v78_v1  ;;  %294 = vmatprep.subr.mxu1 %v78_v1 }
   0x5   :  { %274 = vmatpush3.msra.mxu0 %v78_v1  ;;  %302 = vmatpush3.msra.mxu1 %v78_v1 }
   0x6   :  { %8 = vsyncpa [#allocation4], 0  ;;  %275 = vmatprep.subr.mxu0 %v77_v3  ;;  %295 = vmatprep.subr.mxu1 %v77_v3  ;;  %v75_v5 = vld [vmem:[%s420_s0 + $0x18] sm:$0xff]  ;;  %v74_v6 = vld [vmem:[%s420_s0 + $0x10] sm:$0xff]  ;;  %vm80_vm1 = vcmask 523264   ;;  %vm227_vm2 = vcmask 0  }
   0x7   :  { %276 = vmatpush3.msra.mxu0 %v77_v3  ;;  %303 = vmatpush3.msra.mxu1 %v77_v3  ;;  %v73_v7 = vld [vmem:[%s420_s0 + $0x8] sm:$0xff]  ;;  %v72_v8 = vld [vmem:[%s420_s0] sm:$0xff]  ;;  %v70_v10 = vld [vmem:[%s421_s1 + $0x10] sm:$0xff] }
   0x8   :  { %277 = vmatprep.subr.mxu0 %v76_v4  ;;  %296 = vmatprep.subr.mxu1 %v76_v4  ;;  %v68_v9 = vld [vmem:[%s421_s1] sm:$0xff]  ;;  %v69_v11 = vld [vmem:[%s421_s1 + $0x8] sm:$0xff]  ;;  %v71_v12 = vld [vmem:[%s421_s1 + $0x18] sm:$0xff] }
   0x9   :  { %278 = vmatpush3.msra.mxu0 %v76_v4  ;;  %304 = vmatpush3.msra.mxu1 %v76_v4  ;;  %v179_v13 = vld [vmem:[%s422_s2 + $0x8] sm:$0xff]  ;;  %v181_v14 = vld [vmem:[%s422_s2 + $0x18] sm:$0xff]  ;;  %v178_v17 = vld [vmem:[%s422_s2] sm:$0xff] }
   0xa   :  { %279 = vmatprep.subr.mxu0 %v75_v5  ;;  %297 = vmatprep.subr.mxu1 %v75_v5  ;;  %v180_v18 = vld [vmem:[%s422_s2 + $0x10] sm:$0xff]  ;;  %v187_v21 = vld [vmem:[#allocation2 + $0x8] sm:$0xff]  ;;  %v189_v22 = vld [vmem:[#allocation2 + $0x18] sm:$0xff]  ;;  %s336_s2 = smov [#allocation3]  }
   0xb   :  { %280 = vmatpush3.msra.mxu0 %v75_v5  ;;  %305 = vmatpush3.msra.mxu1 %v75_v5  ;;  %v186_v29 = vld [vmem:[#allocation2] sm:$0xff]  ;;  %v188_v30 = vld [vmem:[#allocation2 + $0x10] sm:$0xff]  ;;  %s235_s15 = sshll.u32 %s336_s2, 4  ;;  %s236_s15 = int_to_ptr.vmem [resolvable:$true] %s235_s15 }
   0xc   :  { %281 = vmatprep.subr.mxu0 %v74_v6  ;;  %298 = vmatprep.subr.mxu1 %v74_v6  ;;  %s313_s17 = scalar_lea.vmem %s236_s15, 16  ;;  %s317_s18 = scalar_lea.vmem %s236_s15, 32 }
   0xd   :  { %282 = vmatpush3.msra.mxu0 %v74_v6  ;;  %306 = vmatpush3.msra.mxu1 %v74_v6  ;;  %p314_p0 = scmp.ne.s32.totalorder %s236_s15, %s313_s17  ;;  %p318_p1 = scmp.lt.s32.totalorder %s236_s15, %s236_s15 }
   0xe   :  { %283 = vmatprep.subr.mxu0 %v73_v7  ;;  %299 = vmatprep.subr.mxu1 %v73_v7  ;;  %p319_p2 = scmp.lt.s32.totalorder %s317_s18, %s313_s17 }
   0xf   :  { %284 = vmatpush3.msra.mxu0 %v73_v7  ;;  %307 = vmatpush3.msra.mxu1 %v73_v7 }
  0x10   :  { %285 = vmatprep.subr.mxu0 %v72_v8  ;;  %300 = vmatprep.subr.mxu1 %v72_v8  ;;  %p320_p3 = por %p319_p2, %p318_p1 }
  0x11   :  { %286 = vmatpush3.msra.mxu0 %v72_v8  ;;  %308 = vmatpush3.msra.mxu1 %v72_v8 }
  0x12   :  { %287 = vmatprep.mubr.msk.f32.mxu0 %vm80_vm1, %v68_v9  ;;  %290 = vmatprep.mubr.msk.f32.mxu1 %vm80_vm1, %v70_v10  ;;  %p321_p4 = pnand %p320_p3, %p314_p0 }
  0x13   :  { %288 = vmatmul.mubr.msk.f32.vlgmr.msra.gmra.mxu0 %vm80_vm1, %v69_v11  ;;  %291 = vmatmul.mubr.msk.f32.vlgmr.msra.gmra.mxu1 %vm80_vm1, %v71_v12 }
  0xd3   :  { %v289_v15 = vpop.f32.mrf.mxu0  ;;  %v292_v16 = vpop.f32.mrf.mxu1 }
  0xd4   :  { %v183_v19 = vsub.f32 %v289_v15, %v179_v13  ;;  %v185_v20 = vsub.f32 %v292_v16, %v181_v14 }
  0xd5   :  { %v159_v23 = vpop.f32.mrf.mxu0  ;;  %v169_v24 = vpop.f32.mrf.mxu1 }
  0xd6   :  { %v191_v25 = vand.u32 2147483647, %v183_v19  ;;  %v193_v26 = vand.u32 2147483647, %v185_v20  ;;  %v182_v27 = vsub.f32 %v159_v23, %v178_v17  ;;  %v184_v28 = vsub.f32 %v169_v24, %v180_v18 }
  0xd8   :  { %v195_v31 = vadd.f32 %v191_v25, %v187_v21  ;;  %v197_v32 = vadd.f32 %v193_v26, %v189_v22  ;;  %v190_v33 = vand.u32 2147483647, %v182_v27  ;;  %v192_v34 = vand.u32 2147483647, %v184_v28 }
  0xda   :  { %200 = vst.msk [vmem:[#allocation2 + $0x8] sm:$0xff] %vm63_vm0, %v195_v31  ;;  %202 = vst.msk [vmem:[#allocation2 + $0x18] sm:$0xff] %vm63_vm0, %v197_v32  ;;  %v194_v35 = vadd.f32 %v190_v33, %v186_v29  ;;  %v196_v36 = vadd.f32 %v192_v34, %v188_v30 }
  0xdc   :  { %199 = vst.msk [vmem:[#allocation2] sm:$0xff] %vm63_vm0, %v194_v35  ;;  %201 = vst.msk [vmem:[#allocation2 + $0x10] sm:$0xff] %vm63_vm0, %v196_v36 }
  0xe1   :  { %v207_v37 = vld [vmem:[#allocation2 + $0x8] sm:$0xff]  ;;  %v209_v42 = vld [vmem:[#allocation2 + $0x18] sm:$0xff] }
  0xe2   :  { %v211_v41 = vsel %vm63_vm0, %v207_v37, 0.0  ;;  %v215_v46 = vsel %vm63_vm0, %v209_v42, 0.0 }
  0xe3   :  { %v206_v38 = vld [vmem:[#allocation2] sm:$0xff]  ;;  %v208_v39 = vld [vmem:[#allocation2 + $0x10] sm:$0xff] }
  0xe4   :  { %v210_v40 = vsel %vm63_vm0, %v206_v38, 0.0  ;;  %v213_v44 = vsel %vm63_vm0, %v208_v39, 0.0 }
  0xe5   :  { %v212_v43 = vadd.f32 %v211_v41, %v210_v40 }
  0xe7   :  { %v214_v45 = vadd.f32 %v213_v44, %v212_v43 }
  0xe9   :  { %v216_v47 = vadd.f32 %v215_v46, %v214_v45 }
  0xeb   :  { %217 = vadd.xlane.f32.xlu0 %v216_v47 }
 0x174   :  { %v218_v48 = vpop.xlane.xlu0 %217 }
 0x175   :  { %v219_v49 = vrot.slane %v218_v48, 4 }
 0x177   :  { %v220_v50 = vadd.f32 %v219_v49, %v218_v48 }
 0x179   :  { %v221_v51 = vrot.slane %v220_v50, 2 }
 0x17b   :  { %v222_v52 = vadd.f32 %v221_v51, %v220_v50 }
 0x17d   :  { %v223_v53 = vrot.slane %v222_v52, 1 }
 0x17f   :  { %v224_v54 = vadd.f32 %v223_v53, %v222_v52 }
 0x181   :  { %309 = vpush %v224_v54 }
 0x1b2   :  { %s310_s16 = spop %309 }
 0x1b3   :  { %v226_v55 = vstv %s310_s16 }
 0x1b4   :  { %228 = vst.msk [vmem:[#allocation3] sm:$0x1] %vm227_vm2, %v226_v55 }
 0x1b5   :  { %324 = shalt.err (!%p321_p4)
}
 0x1b6   :  { %238 = dma.vmem_to_hbm [thread:$0]  %s236_s15, 16, %s423_s3, [#allocation4]  }
 0x1b7   :  { %333 = dma.done.wait [#allocation4], 16  }
 0x1b8   :  { %334 = vsyncadd [#allocation4], 4294967280 }
 0x1b9   :  { %242 = vsyncpa [#allocation4], 1 }

</bundles_post_ra>
